<compile_context>
chip_gen: v5e
topology: v5e:2x2
jax: 0.10.0
libtpu: 0.0.40
codegen_flags: <defaults>
</compile_context>

<pallas_src>
import functools

import jax
import jax.numpy as jnp
from jax.experimental import pallas as pl
from jax.experimental.pallas import tpu as pltpu

LOG_STD_MIN = -20.0
LOG_STD_MAX = 2.0
LN_EPS = 1e-5


def _round_up(x, m):
    return ((x + m - 1) // m) * m


def _layernorm(x, gamma, beta):
    # x: (B, F) float32; normalize over last axis (biased var, like torch).
    mu = jnp.mean(x, axis=-1, keepdims=True)
    xc = x - mu
    var = jnp.mean(xc * xc, axis=-1, keepdims=True)
    inv = jax.lax.rsqrt(var + LN_EPS)
    return xc * inv * gamma + beta


def gaussian_policy_kernel(
    state_ref,       # (TB, input_dims)
    w1_ref,          # (input_dims, fc1)
    aux1_ref,        # (3, fc1)  rows: bias, gamma, beta
    w2_ref,          # (fc1, fc2)
    aux2_ref,        # (3, fc2)
    wh_ref,          # (fc2, HP) fused [mean | log_std | pad] head weights
    bh_ref,          # (1, HP)
    out_ref,         # (TB, HP)  packed [mean | clamped log_std | pad]
    *,
    action_dims,
):
    x = state_ref[...]  # already f32, no redundant cast

    # linear1 -> layernorm1 -> relu
    h1 = jnp.dot(x, w1_ref[...], preferred_element_type=jnp.float32)
    h1 = h1 + aux1_ref[0:1, :]
    h1 = _layernorm(h1, aux1_ref[1:2, :], aux1_ref[2:3, :])
    h1 = jnp.maximum(h1, 0.0)

    # linear2 -> layernorm2 -> relu
    h2 = jnp.dot(h1, w2_ref[...], preferred_element_type=jnp.float32)
    h2 = h2 + aux2_ref[0:1, :]
    h2 = _layernorm(h2, aux2_ref[1:2, :], aux2_ref[2:3, :])
    h2 = jnp.maximum(h2, 0.0)

    # fused heads: one matmul instead of two, lane-dense output
    head = jnp.dot(h2, wh_ref[...], preferred_element_type=jnp.float32) + bh_ref[...]

    # clamp only the log_std columns [A, 2A) via a lane mask (pure VPU, no slicing)
    col = jax.lax.broadcasted_iota(jnp.int32, head.shape, 1)
    is_log_std = (col >= action_dims) & (col < 2 * action_dims)
    head = jnp.where(is_log_std, jnp.clip(head, LOG_STD_MIN, LOG_STD_MAX), head)

    out_ref[...] = head.astype(out_ref.dtype)


def pack_params(p):
    """Packs PyTorch-layout params into the kernel's 6-array representation."""
    action_dims, fc2 = p["mean_w"].shape
    hp = max(128, _round_up(2 * action_dims, 128))

    w1 = p["linear1_w"].T.astype(jnp.float32)                      # (in, fc1)
    aux1 = jnp.stack([p["linear1_b"], p["ln1_g"], p["ln1_b"]]).astype(jnp.float32)
    w2 = p["linear2_w"].T.astype(jnp.float32)                      # (fc1, fc2)
    aux2 = jnp.stack([p["linear2_b"], p["ln2_g"], p["ln2_b"]]).astype(jnp.float32)

    wh = jnp.zeros((fc2, hp), jnp.float32)
    wh = wh.at[:, :action_dims].set(p["mean_w"].T)
    wh = wh.at[:, action_dims:2 * action_dims].set(p["logstd_w"].T)
    bh = jnp.zeros((1, hp), jnp.float32)
    bh = bh.at[0, :action_dims].set(p["mean_b"])
    bh = bh.at[0, action_dims:2 * action_dims].set(p["logstd_b"])

    packed = {"w1": w1, "aux1": aux1, "w2": w2, "aux2": aux2, "wh": wh, "bh": bh}
    return packed, action_dims


@functools.partial(jax.jit, static_argnames=("action_dims",))
def gaussian_policy_forward(state, packed, action_dims):
    """state: (B, input_dims) -> (mean, log_std), each (B, action_dims)."""
    B, input_dims = state.shape
    fc1 = packed["w1"].shape[1]
    fc2 = packed["w2"].shape[1]
    hp = packed["wh"].shape[1]

    # Batch tile: multiple of 8 sublanes, capped at 128; modest VMEM footprint
    # so it fits v5e's 16 MiB scoped default and v7x's 64 MiB physical VMEM.
    tb = min(128, _round_up(B, 8))
    b_pad = _round_up(B, tb)

    x = state.astype(jnp.float32)
    if b_pad != B:
        x = jnp.pad(x, ((0, b_pad - B), (0, 0)))

    grid = (b_pad // tb,)

    def full_block(shape):
        return pl.BlockSpec(shape, lambda i: (0, 0))   # weights VMEM-resident

    in_specs = [
        pl.BlockSpec((tb, input_dims), lambda i: (i, 0)),
        full_block(packed["w1"].shape),
        full_block(packed["aux1"].shape),
        full_block(packed["w2"].shape),
        full_block(packed["aux2"].shape),
        full_block(packed["wh"].shape),
        full_block(packed["bh"].shape),
    ]
    out_spec = pl.BlockSpec((tb, hp), lambda i: (i, 0))

    flops = 2 * b_pad * (input_dims * fc1 + fc1 * fc2 + fc2 * hp)
    bytes_accessed = 4 * (
        x.size + sum(int(v.size) for v in packed.values()) + b_pad * hp
    )
    cost = pl.CostEstimate(
        flops=flops, transcendentals=2 * b_pad, bytes_accessed=bytes_accessed
    )

    out = pl.pallas_call(
        functools.partial(gaussian_policy_kernel, action_dims=action_dims),
        out_shape=jax.ShapeDtypeStruct((b_pad, hp), jnp.float32),
        grid=grid,
        in_specs=in_specs,
        out_specs=out_spec,
        compiler_params=pltpu.CompilerParams(dimension_semantics=("parallel",)),
        cost_estimate=cost,
    )(x, packed["w1"], packed["aux1"], packed["w2"], packed["aux2"],
      packed["wh"], packed["bh"])

    mean = out[:B, :action_dims]
    log_std = out[:B, action_dims:2 * action_dims]
    return mean, log_std


# ----------------------------- init & reference -----------------------------

def xavier_uniform(key, fan_in, fan_out, gain=1.0):
    # matches torch.nn.init.xavier_uniform_ on a (fan_out, fan_in) weight
    limit = gain * jnp.sqrt(6.0 / (fan_in + fan_out))
    return jax.random.uniform(key, (fan_out, fan_in), jnp.float32, -limit, limit)


def init_params(key, input_dims, fc1_dims, fc2_dims, action_dims):
    """PyTorch-layout params: Linear weights (out, in), biases 0, LN affine 1/0."""
    k1, k2, k3, k4 = jax.random.split(key, 4)
    return {
        "linear1_w": xavier_uniform(k1, input_dims, fc1_dims),
        "linear1_b": jnp.zeros((fc1_dims,), jnp.float32),
        "ln1_g": jnp.ones((fc1_dims,), jnp.float32),
        "ln1_b": jnp.zeros((fc1_dims,), jnp.float32),
        "linear2_w": xavier_uniform(k2, fc1_dims, fc2_dims),
        "linear2_b": jnp.zeros((fc2_dims,), jnp.float32),
        "ln2_g": jnp.ones((fc2_dims,), jnp.float32),
        "ln2_b": jnp.zeros((fc2_dims,), jnp.float32),
        "mean_w": xavier_uniform(k3, fc2_dims, action_dims),
        "mean_b": jnp.zeros((action_dims,), jnp.float32),
        "logstd_w": xavier_uniform(k4, fc2_dims, action_dims),
        "logstd_b": jnp.zeros((action_dims,), jnp.float32),
    }


def reference_forward(state, p):
    # plain-JAX reference matching the PyTorch module
    x = state @ p["linear1_w"].T + p["linear1_b"]
    x = _layernorm(x, p["ln1_g"], p["ln1_b"])
    x = jnp.maximum(x, 0.0)
    x = x @ p["linear2_w"].T + p["linear2_b"]
    x = _layernorm(x, p["ln2_g"], p["ln2_b"])
    x = jnp.maximum(x, 0.0)
    mean = x @ p["mean_w"].T + p["mean_b"]
    log_std = jnp.clip(x @ p["logstd_w"].T + p["logstd_b"], LOG_STD_MIN, LOG_STD_MAX)
    return mean, log_std


if __name__ == "__main__":
    B, INPUT_DIMS, FC1, FC2, ACTION_DIMS = 2, 16, 32, 32, 8

    key = jax.random.PRNGKey(0)
    k_params, k_state = jax.random.split(key)
    params = init_params(k_params, INPUT_DIMS, FC1, FC2, ACTION_DIMS)
    state = jax.random.normal(k_state, (B, INPUT_DIMS), jnp.float32)

    packed, a_dims = pack_params(params)
    mean, log_std = gaussian_policy_forward(state, packed, a_dims)
    jax.block_until_ready((mean, log_std))

    mean_ref, log_std_ref = reference_forward(state, params)
    assert mean.shape == (B, ACTION_DIMS) and log_std.shape == (B, ACTION_DIMS)
    assert jnp.allclose(mean, mean_ref, atol=1e-5, rtol=1e-5)
    assert jnp.allclose(log_std, log_std_ref, atol=1e-5, rtol=1e-5)
    assert bool(jnp.all(log_std >= LOG_STD_MIN)) and bool(jnp.all(log_std <= LOG_STD_MAX))

    # TODO(synk): sample() (rsample + tanh-squash log-prob) is stochastic and
    # lives outside the deterministic forward hot path; not implemented here.
    print("KERNEL_OK")
</pallas_src>

<mosaic_0001>
module attributes {stable_mosaic.version = 11 : i64} {
  func.func @gaussian_policy_kernel(%arg0: i32, %arg1: memref<8x16xf32, #tpu.memory_space<vmem>>, %arg2: memref<16x32xf32, #tpu.memory_space<vmem>>, %arg3: memref<3x32xf32, #tpu.memory_space<vmem>>, %arg4: memref<32x32xf32, #tpu.memory_space<vmem>>, %arg5: memref<3x32xf32, #tpu.memory_space<vmem>>, %arg6: memref<32x128xf32, #tpu.memory_space<vmem>>, %arg7: memref<1x128xf32, #tpu.memory_space<vmem>>, %arg8: memref<8x128xf32, #tpu.memory_space<vmem>>) attributes {dimension_semantics = [#tpu.dimension_semantics<parallel>], iteration_bounds = array<i64: 1>, scalar_prefetch = 0 : i64, scratch_operands = 0 : i64, tpu.core_type = #tpu.core_type<tc>, window_params = [{transform_indices = @transform_0, window_bounds = array<i64: 8, 16>}, {pipeline_mode = #tpu.pipeline_mode<synchronous>, transform_indices = @transform_1, window_bounds = array<i64: 16, 32>}, {pipeline_mode = #tpu.pipeline_mode<synchronous>, transform_indices = @transform_2, window_bounds = array<i64: 3, 32>}, {pipeline_mode = #tpu.pipeline_mode<synchronous>, transform_indices = @transform_3, window_bounds = array<i64: 32, 32>}, {pipeline_mode = #tpu.pipeline_mode<synchronous>, transform_indices = @transform_4, window_bounds = array<i64: 3, 32>}, {pipeline_mode = #tpu.pipeline_mode<synchronous>, transform_indices = @transform_5, window_bounds = array<i64: 32, 128>}, {pipeline_mode = #tpu.pipeline_mode<synchronous>, transform_indices = @transform_6, window_bounds = array<i64: 1, 128>}, {transform_indices = @transform_7, window_bounds = array<i64: 8, 128>}]} {
    %c0 = arith.constant 0 : index
    %c0_0 = arith.constant 0 : index
    %0 = vector.load %arg1[%c0, %c0_0] : memref<8x16xf32, #tpu.memory_space<vmem>>, vector<8x16xf32>
    %c0_1 = arith.constant 0 : index
    %c0_2 = arith.constant 0 : index
    %1 = vector.load %arg2[%c0_1, %c0_2] : memref<16x32xf32, #tpu.memory_space<vmem>>, vector<16x32xf32>
    %cst = arith.constant dense<0.000000e+00> : vector<8x32xf32>
    %2 = tpu.matmul %0, %1, %cst {dimension_numbers = #tpu.dot_dimension_numbers<[1], [0], [0], [1], [0, 0, 1, 1], [], []>} : vector<8x16xf32>, vector<16x32xf32>, vector<8x32xf32> -> vector<8x32xf32>
    %c0_3 = arith.constant 0 : index
    %c0_4 = arith.constant 0 : index
    %3 = vector.load %arg3[%c0_3, %c0_4] : memref<3x32xf32, #tpu.memory_space<vmem>>, vector<1x32xf32>
    %4 = vector.broadcast %3 : vector<1x32xf32> to vector<8x32xf32>
    %5 = arith.addf %2, %4 : vector<8x32xf32>
    %c1 = arith.constant 1 : index
    %c0_5 = arith.constant 0 : index
    %6 = vector.load %arg3[%c1, %c0_5] : memref<3x32xf32, #tpu.memory_space<vmem>>, vector<1x32xf32>
    %c2 = arith.constant 2 : index
    %c0_6 = arith.constant 0 : index
    %7 = vector.load %arg3[%c2, %c0_6] : memref<3x32xf32, #tpu.memory_space<vmem>>, vector<1x32xf32>
    %cst_7 = arith.constant dense<0.000000e+00> : vector<8xf32>
    %8 = vector.multi_reduction <add>, %5, %cst_7 [1] : vector<8x32xf32> to vector<8xf32>
    %9 = vector.shape_cast %8 : vector<8xf32> to vector<8x1xf32>
    %cst_8 = arith.constant 3.200000e+01 : f32
    %10 = vector.broadcast %cst_8 : f32 to vector<8x1xf32>
    %11 = arith.divf %9, %10 : vector<8x1xf32>
    %12 = vector.broadcast %11 : vector<8x1xf32> to vector<8x32xf32>
    %13 = arith.subf %5, %12 : vector<8x32xf32>
    %14 = arith.mulf %13, %13 : vector<8x32xf32>
    %cst_9 = arith.constant dense<0.000000e+00> : vector<8xf32>
    %15 = vector.multi_reduction <add>, %14, %cst_9 [1] : vector<8x32xf32> to vector<8xf32>
    %16 = vector.shape_cast %15 : vector<8xf32> to vector<8x1xf32>
    %cst_10 = arith.constant 3.200000e+01 : f32
    %17 = vector.broadcast %cst_10 : f32 to vector<8x1xf32>
    %18 = arith.divf %16, %17 : vector<8x1xf32>
    %cst_11 = arith.constant 9.99999974E-6 : f32
    %19 = vector.broadcast %cst_11 : f32 to vector<8x1xf32>
    %20 = arith.addf %18, %19 : vector<8x1xf32>
    %21 = math.rsqrt %20 : vector<8x1xf32>
    %22 = vector.broadcast %21 : vector<8x1xf32> to vector<8x32xf32>
    %23 = arith.mulf %13, %22 : vector<8x32xf32>
    %24 = vector.broadcast %6 : vector<1x32xf32> to vector<8x32xf32>
    %25 = arith.mulf %23, %24 : vector<8x32xf32>
    %26 = vector.broadcast %7 : vector<1x32xf32> to vector<8x32xf32>
    %27 = arith.addf %25, %26 : vector<8x32xf32>
    %cst_12 = arith.constant 0.000000e+00 : f32
    %28 = vector.broadcast %cst_12 : f32 to vector<8x32xf32>
    %29 = arith.maximumf %27, %28 : vector<8x32xf32>
    %c0_13 = arith.constant 0 : index
    %c0_14 = arith.constant 0 : index
    %30 = vector.load %arg4[%c0_13, %c0_14] : memref<32x32xf32, #tpu.memory_space<vmem>>, vector<32x32xf32>
    %cst_15 = arith.constant dense<0.000000e+00> : vector<8x32xf32>
    %31 = tpu.matmul %29, %30, %cst_15 {dimension_numbers = #tpu.dot_dimension_numbers<[1], [0], [0], [1], [0, 0, 1, 1], [], []>} : vector<8x32xf32>, vector<32x32xf32>, vector<8x32xf32> -> vector<8x32xf32>
    %c0_16 = arith.constant 0 : index
    %c0_17 = arith.constant 0 : index
    %32 = vector.load %arg5[%c0_16, %c0_17] : memref<3x32xf32, #tpu.memory_space<vmem>>, vector<1x32xf32>
    %33 = vector.broadcast %32 : vector<1x32xf32> to vector<8x32xf32>
    %34 = arith.addf %31, %33 : vector<8x32xf32>
    %c1_18 = arith.constant 1 : index
    %c0_19 = arith.constant 0 : index
    %35 = vector.load %arg5[%c1_18, %c0_19] : memref<3x32xf32, #tpu.memory_space<vmem>>, vector<1x32xf32>
    %c2_20 = arith.constant 2 : index
    %c0_21 = arith.constant 0 : index
    %36 = vector.load %arg5[%c2_20, %c0_21] : memref<3x32xf32, #tpu.memory_space<vmem>>, vector<1x32xf32>
    %cst_22 = arith.constant dense<0.000000e+00> : vector<8xf32>
    %37 = vector.multi_reduction <add>, %34, %cst_22 [1] : vector<8x32xf32> to vector<8xf32>
    %38 = vector.shape_cast %37 : vector<8xf32> to vector<8x1xf32>
    %cst_23 = arith.constant 3.200000e+01 : f32
    %39 = vector.broadcast %cst_23 : f32 to vector<8x1xf32>
    %40 = arith.divf %38, %39 : vector<8x1xf32>
    %41 = vector.broadcast %40 : vector<8x1xf32> to vector<8x32xf32>
    %42 = arith.subf %34, %41 : vector<8x32xf32>
    %43 = arith.mulf %42, %42 : vector<8x32xf32>
    %cst_24 = arith.constant dense<0.000000e+00> : vector<8xf32>
    %44 = vector.multi_reduction <add>, %43, %cst_24 [1] : vector<8x32xf32> to vector<8xf32>
    %45 = vector.shape_cast %44 : vector<8xf32> to vector<8x1xf32>
    %cst_25 = arith.constant 3.200000e+01 : f32
    %46 = vector.broadcast %cst_25 : f32 to vector<8x1xf32>
    %47 = arith.divf %45, %46 : vector<8x1xf32>
    %cst_26 = arith.constant 9.99999974E-6 : f32
    %48 = vector.broadcast %cst_26 : f32 to vector<8x1xf32>
    %49 = arith.addf %47, %48 : vector<8x1xf32>
    %50 = math.rsqrt %49 : vector<8x1xf32>
    %51 = vector.broadcast %50 : vector<8x1xf32> to vector<8x32xf32>
    %52 = arith.mulf %42, %51 : vector<8x32xf32>
    %53 = vector.broadcast %35 : vector<1x32xf32> to vector<8x32xf32>
    %54 = arith.mulf %52, %53 : vector<8x32xf32>
    %55 = vector.broadcast %36 : vector<1x32xf32> to vector<8x32xf32>
    %56 = arith.addf %54, %55 : vector<8x32xf32>
    %cst_27 = arith.constant 0.000000e+00 : f32
    %57 = vector.broadcast %cst_27 : f32 to vector<8x32xf32>
    %58 = arith.maximumf %56, %57 : vector<8x32xf32>
    %c0_28 = arith.constant 0 : index
    %c0_29 = arith.constant 0 : index
    %59 = vector.load %arg6[%c0_28, %c0_29] : memref<32x128xf32, #tpu.memory_space<vmem>>, vector<32x128xf32>
    %cst_30 = arith.constant dense<0.000000e+00> : vector<8x128xf32>
    %60 = tpu.matmul %58, %59, %cst_30 {dimension_numbers = #tpu.dot_dimension_numbers<[1], [0], [0], [1], [0, 0, 1, 1], [], []>} : vector<8x32xf32>, vector<32x128xf32>, vector<8x128xf32> -> vector<8x128xf32>
    %c0_31 = arith.constant 0 : index
    %c0_32 = arith.constant 0 : index
    %61 = vector.load %arg7[%c0_31, %c0_32] : memref<1x128xf32, #tpu.memory_space<vmem>>, vector<1x128xf32>
    %62 = vector.broadcast %61 : vector<1x128xf32> to vector<8x128xf32>
    %63 = arith.addf %60, %62 : vector<8x128xf32>
    %64 = tpu.iota {dimensions = array<i32: 1>} : vector<8x128xi32>
    %c8_i32 = arith.constant 8 : i32
    %65 = vector.broadcast %c8_i32 : i32 to vector<8x128xi32>
    %66 = arith.cmpi sge, %64, %65 : vector<8x128xi32>
    %c16_i32 = arith.constant 16 : i32
    %67 = vector.broadcast %c16_i32 : i32 to vector<8x128xi32>
    %68 = arith.cmpi slt, %64, %67 : vector<8x128xi32>
    %69 = arith.andi %66, %68 : vector<8x128xi1>
    %cst_33 = arith.constant -2.000000e+01 : f32
    %cst_34 = arith.constant 2.000000e+00 : f32
    %70 = vector.broadcast %cst_33 : f32 to vector<8x128xf32>
    %71 = arith.maximumf %70, %63 : vector<8x128xf32>
    %72 = vector.broadcast %cst_34 : f32 to vector<8x128xf32>
    %73 = arith.minimumf %72, %71 : vector<8x128xf32>
    %74 = arith.select %69, %73, %63 : vector<8x128xi1>, vector<8x128xf32>
    %c0_35 = arith.constant 0 : index
    %c0_36 = arith.constant 0 : index
    %75 = vector.load %arg8[%c0_35, %c0_36] : memref<8x128xf32, #tpu.memory_space<vmem>>, vector<8x128xf32>
    tpu.vector_store %arg8[%c0_35, %c0_36], %74 {strides = array<i32>} : memref<8x128xf32, #tpu.memory_space<vmem>>, vector<8x128xf32>,
    return
  }
  func.func @transform_0(%arg0: i32) -> (i32, i32) {
    %c0_i32 = arith.constant 0 : i32
    %c0_i32_0 = arith.constant 0 : i32
    return %arg0, %c0_i32 : i32, i32
  }
  func.func @transform_1(%arg0: i32) -> (i32, i32) {
    %c0_i32 = arith.constant 0 : i32
    %c0_i32_0 = arith.constant 0 : i32
    %c0_i32_1 = arith.constant 0 : i32
    return %c0_i32, %c0_i32_0 : i32, i32
  }
  func.func @transform_2(%arg0: i32) -> (i32, i32) {
    %c0_i32 = arith.constant 0 : i32
    %c0_i32_0 = arith.constant 0 : i32
    %c0_i32_1 = arith.constant 0 : i32
    return %c0_i32, %c0_i32_0 : i32, i32
  }
  func.func @transform_3(%arg0: i32) -> (i32, i32) {
    %c0_i32 = arith.constant 0 : i32
    %c0_i32_0 = arith.constant 0 : i32
    %c0_i32_1 = arith.constant 0 : i32
    return %c0_i32, %c0_i32_0 : i32, i32
  }
  func.func @transform_4(%arg0: i32) -> (i32, i32) {
    %c0_i32 = arith.constant 0 : i32
    %c0_i32_0 = arith.constant 0 : i32
    %c0_i32_1 = arith.constant 0 : i32
    return %c0_i32, %c0_i32_0 : i32, i32
  }
  func.func @transform_5(%arg0: i32) -> (i32, i32) {
    %c0_i32 = arith.constant 0 : i32
    %c0_i32_0 = arith.constant 0 : i32
    %c0_i32_1 = arith.constant 0 : i32
    return %c0_i32, %c0_i32_0 : i32, i32
  }
  func.func @transform_6(%arg0: i32) -> (i32, i32) {
    %c0_i32 = arith.constant 0 : i32
    %c0_i32_0 = arith.constant 0 : i32
    %c0_i32_1 = arith.constant 0 : i32
    return %c0_i32, %c0_i32_0 : i32, i32
  }
  func.func @transform_7(%arg0: i32) -> (i32, i32) {
    %c0_i32 = arith.constant 0 : i32
    %c0_i32_0 = arith.constant 0 : i32
    return %arg0, %c0_i32 : i32, i32
  }
}

</mosaic_0001>

<bundles_post_ra>
// kernel: gaussian_policy_forward.1
= control target key start
LH: loop header
LB: loop body
LE: loop exit
PB: predicated region body
PF: predicated region fallthrough
CT: control target
= control target key end

     0   :  { %12 = vsyncpa [#allocation3], 0  ;;  %s429_s0 = inlined_call_operand.vmem [shape: f32[8,16], index: 0, kind: input, shape index: {}]   ;;  %s430_s1 = inlined_call_operand.hbm [shape: f32[16,32], index: 1, kind: input, shape index: {}]   ;;  %s431_s2 = inlined_call_operand.vmem [shape: f32[3,32], index: 2, kind: input, shape index: {}]   ;;  %s432_s3 = inlined_call_operand.hbm [shape: f32[32,32], index: 3, kind: input, shape index: {}]   ;;  %s433_s4 = inlined_call_operand.vmem [shape: f32[3,32], index: 4, kind: input, shape index: {}]   ;;  %s434_s5 = inlined_call_operand.hbm [shape: f32[32,128], index: 5, kind: input, shape index: {}]   ;;  %s435_s6 = inlined_call_operand.vmem [shape: f32[1,128], index: 6, kind: input, shape index: {}]   ;;  %s436_s7 = inlined_call_operand.vmem [shape: f32[8,128], index: 7, kind: output, shape index: {}]  }
   0x1   :  { %13 = vsyncpa [#allocation5], 0  ;;  %s35_s26 = sshll.u32 %s432_s3, 4  ;;  %s341_s27 = smov [#allocation4]   ;;  %s36_s26 = int_to_ptr.hbm [resolvable:$true] %s35_s26 }
   0x2   :  { %s37_s28 = sshll.u32 %s341_s27, 4  ;;  %s20_s8 = sshll.u32 %s430_s1, 4  ;;  %s38_s28 = int_to_ptr.vmem [resolvable:$true] %s37_s28  ;;  %s21_s8 = int_to_ptr.hbm [resolvable:$true] %s20_s8 }
   0x3   :  { %s342_s9 = smov 128   ;;  %s343_s10 = smov 8  }
   0x4   :  { %43 = dma.hbm_to_vmem [thread:$0]  %s36_s26, 512, %s38_s28, [#allocation5], %s342_s9, %s342_s9, %s343_s10  }
   0x5   :  { %s344_s11 = smov [#allocation2]   ;;  %s50_s15 = sshll.u32 %s434_s5, 4  ;;  %s51_s15 = int_to_ptr.hbm [resolvable:$true] %s50_s15 }
   0x6   :  { %s22_s12 = sshll.u32 %s344_s11, 4  ;;  %s345_s3 = smov [#allocation6]   ;;  %s23_s12 = int_to_ptr.vmem [resolvable:$true] %s22_s12 }
   0x7   :  { %28 = dma.hbm_to_vmem [thread:$0]  %s21_s8, 256, %s23_s12, [#allocation3], %s342_s9, %s342_s9, %s343_s10  }
   0x8   :  { %s52_s16 = sshll.u32 %s345_s3, 4  ;;  %s53_s16 = int_to_ptr.vmem [resolvable:$true] %s52_s16 }
   0x9   :  { %58 = dma.hbm_to_vmem [thread:$0]  %s51_s15, 512, %s53_s16, [#allocation5], %s342_s9, %s342_s9, %s343_s10  }
   0xa   :  { %337 = dma.done.wait [#allocation3], 256  }
   0xb   :  { %338 = vsyncadd [#allocation3], 4294967040 }
   0xc   :  { %339 = dma.done.wait [#allocation5], 1024  }
   0xd   :  { %340 = vsyncadd [#allocation5], 4294966272  ;;  %v75_v0 = vld [vmem:[#allocation2 + $0x8] sm:$0xff]  ;;  %v74_v1 = vld [vmem:[#allocation2] sm:$0xff]  ;;  %vm78_vm0 = vcmask 130048   ;;  %vm104_vm1 = vcmask 261120  }
   0xe   :  { %96 = vmatpush.msra.mxu0 %v75_v0  ;;  %v73_v2 = vld [vmem:[%s429_s0] sm:$0xff]  ;;  %v346_v7 = vmov 32.0   ;;  %v142_v19 = vld [vmem:[#allocation4 + $0x18] sm:$0xff]  ;;  %v140_v21 = vld [vmem:[#allocation4 + $0x8] sm:$0xff] }
   0xf   :  { %v252_v3 = vld [vmem:[%s431_s2] ss:$0 sm:$0xff]  ;;  %259 = vrcp.f32 %v346_v7  ;;  %160 = vmatpush.msra.mxu1 %v142_v19  ;;  %v139_v22 = vld [vmem:[#allocation4] sm:$0xff]  ;;  %v253_v32 = vld [vmem:[%s431_s2 + $0x1] ss:$0 sm:$0xff] }
  0x10   :  { %97 = vmatpush.msra.mxu0 %v74_v1  ;;  %v141_v20 = vld [vmem:[#allocation4 + $0x10] sm:$0xff]  ;;  %v200_v48 = vld [vmem:[#allocation6 + $0x18] sm:$0xff]  ;;  %v198_v50 = vld [vmem:[#allocation6 + $0x8] sm:$0xff] }
  0x11   :  { %243 = vmatmul.msk.f32.vlgmr.msra.gmra.mxu0 %vm78_vm0, %v73_v2  ;;  %161 = vmatpush.msra.mxu1 %v141_v20  ;;  %v254_v35 = vld [vmem:[%s431_s2 + $0x2] ss:$0 sm:$0xff]  ;;  %v255_v39 = vld [vmem:[%s433_s4] ss:$0 sm:$0xff]  ;;  %v197_v51 = vld [vmem:[#allocation6] sm:$0xff] }
  0x12   :  { %v199_v49 = vld [vmem:[#allocation6 + $0x10] sm:$0xff]  ;;  %220 = vmatpush.msra.mxu2 %v200_v48 }
  0x13   :  { %162 = vmatpush.msra.mxu1 %v140_v21  ;;  %v256_v61 = vld [vmem:[%s433_s4 + $0x1] ss:$0 sm:$0xff]  ;;  %v257_v0 = vld [vmem:[%s433_s4 + $0x2] ss:$0 sm:$0xff] }
  0x14   :  { %221 = vmatpush.msra.mxu2 %v199_v49 }
  0x15   :  { %v260_v8 = vpop.eup %259  ;;  %163 = vmatpush.msra.mxu1 %v139_v22 }
  0x16   :  { %v109_v9 = vmul.f32 32.0, %v260_v8  ;;  %vm113_vm2 = vweird.f32 %v260_v8  ;;  %222 = vmatpush.msra.mxu2 %v198_v50 }
  0x18   :  { %v110_v10 = vsub.f32 1.0, %v109_v9  ;;  %223 = vmatpush.msra.mxu2 %v197_v51 }
  0x1a   :  { %v111_v11 = vmul.f32 %v260_v8, %v110_v10 }
  0x1c   :  { %v112_v12 = vadd.f32 %v260_v8, %v111_v11 }
  0x1e   :  { %v114_v13 = vsel %vm113_vm2, %v260_v8, %v112_v12 }
  0x8e   :  { %v99_v4 = vpop.f32.mrf.mxu0 }
  0x8f   :  { %v100_v5 = vadd.f32 %v252_v3, %v99_v4  ;;  %v228_v4 = vlaneseq }
  0x91   :  { %v105_v6 = vsel %vm104_vm1, %v100_v5, 0.0 }
  0x92   :  { %106 = vadd.xlane.f32.xlu0 %v105_v6  ;;  %v229_v6 = vand.u32 127, %v228_v4 }
  0x94   :  { %vm230_vm9 = vcmp.ge.s32.totalorder %v229_v6, 8  ;;  %vm231_vm10 = vcmp.lt.s32.totalorder %v229_v6, 16 }
  0x95   :  { %vm232_vm11 = vmand %vm230_vm9, %vm231_vm10 }
 0x105   :  { %v107_v14 = vpop.xlane.xlu0 %106 }
 0x106   :  { %v115_v15 = vmul.f32 %v114_v13, %v107_v14 }
 0x108   :  { %v116_v16 = vsub.f32 %v100_v5, %v115_v15  ;;  %v258_v5 = vld [vmem:[%s435_s6] ss:$0 sm:$0xff] }
 0x10a   :  { %v117_v17 = vmul.f32 %v116_v16, %v116_v16 }
 0x10c   :  { %v118_v18 = vsel %vm104_vm1, %v117_v17, 0.0 }
 0x10d   :  { %119 = vadd.xlane.f32.xlu0 %v118_v18 }
 0x180   :  { %v120_v23 = vpop.xlane.xlu0 %119 }
 0x181   :  { %v121_v24 = vmul.f32 %v120_v23, %v114_v13 }
 0x183   :  { %v122_v25 = vadd.f32 1e-05, %v121_v24 }
 0x185   :  { %261 = vrsqrt.f32 %v122_v25  ;;  %vm129_vm4 = vweird.f32 %v122_v25 }
 0x18b   :  { %v262_v26 = vpop.eup %261 }
 0x18c   :  { %v124_v27 = vmul.f32 %v262_v26, %v122_v25  ;;  %vm130_vm3 = vweird.f32 %v262_v26 }
 0x18d   :  { %vm131_vm5 = vmor %vm129_vm4, %vm130_vm3 }
 0x18e   :  { %v125_v28 = vmul.f32 %v262_v26, %v124_v27 }
 0x190   :  { %v126_v29 = vmul.f32 0.5, %v125_v28 }
 0x192   :  { %v127_v30 = vsub.f32 1.5, %v126_v29 }
 0x194   :  { %v128_v31 = vmul.f32 %v262_v26, %v127_v30 }
 0x196   :  { %v132_v33 = vsel %vm131_vm5, %v262_v26, %v128_v31 }
 0x197   :  { %v133_v34 = vmul.f32 %v132_v33, %v116_v16 }
 0x199   :  { %v135_v36 = vmul.f32 %v253_v32, %v133_v34 }
 0x19b   :  { %v137_v37 = vadd.f32 %v254_v35, %v135_v36 }
 0x19d   :  { %v138_v38 = vmax.f32 %v137_v37, 0.0 }
 0x19f   :  { %244 = vmatmul.msk.f32.vlgmr.msra.gmra.mxu1 %vm104_vm1, %v138_v38 }
 0x21c   :  { %v165_v40 = vpop.f32.mrf.mxu1 }
 0x21d   :  { %v166_v41 = vadd.f32 %v255_v39, %v165_v40 }
 0x21f   :  { %v170_v42 = vsel %vm104_vm1, %v166_v41, 0.0 }
 0x220   :  { %171 = vadd.xlane.f32.xlu1 %v170_v42 }
 0x293   :  { %v172_v43 = vpop.xlane.xlu1 %171 }
 0x294   :  { %v173_v44 = vmul.f32 %v172_v43, %v114_v13 }
 0x296   :  { %v174_v45 = vsub.f32 %v166_v41, %v173_v44 }
 0x298   :  { %v175_v46 = vmul.f32 %v174_v45, %v174_v45 }
 0x29a   :  { %v176_v47 = vsel %vm104_vm1, %v175_v46, 0.0 }
 0x29b   :  { %177 = vadd.xlane.f32.xlu1 %v176_v47 }
 0x30e   :  { %v178_v52 = vpop.xlane.xlu1 %177 }
 0x30f   :  { %v179_v53 = vmul.f32 %v178_v52, %v114_v13 }
 0x311   :  { %v180_v54 = vadd.f32 1e-05, %v179_v53 }
 0x313   :  { %263 = vrsqrt.f32 %v180_v54  ;;  %vm187_vm7 = vweird.f32 %v180_v54 }
 0x319   :  { %v264_v55 = vpop.eup %263 }
 0x31a   :  { %v182_v56 = vmul.f32 %v264_v55, %v180_v54  ;;  %vm188_vm6 = vweird.f32 %v264_v55 }
 0x31b   :  { %vm189_vm8 = vmor %vm187_vm7, %vm188_vm6 }
 0x31c   :  { %v183_v57 = vmul.f32 %v264_v55, %v182_v56 }
 0x31e   :  { %v184_v58 = vmul.f32 0.5, %v183_v57 }
 0x320   :  { %v185_v59 = vsub.f32 1.5, %v184_v58 }
 0x322   :  { %v186_v60 = vmul.f32 %v264_v55, %v185_v59 }
 0x324   :  { %v190_v62 = vsel %vm189_vm8, %v264_v55, %v186_v60 }
 0x325   :  { %v191_v63 = vmul.f32 %v190_v62, %v174_v45 }
 0x327   :  { %v193_v1 = vmul.f32 %v256_v61, %v191_v63 }
 0x329   :  { %v195_v2 = vadd.f32 %v257_v0, %v193_v1 }
 0x32b   :  { %v196_v3 = vmax.f32 %v195_v2, 0.0 }
 0x32d   :  { %245 = vmatmul.msk.f32.vlgmr.msra.gmra.mxu2 %vm104_vm1, %v196_v3 }
 0x3b0   :  { %v225_v7 = vpop.f32.mrf.mxu2 }
 0x3b1   :  { %v226_v8 = vadd.f32 %v258_v5, %v225_v7 }
 0x3b3   :  { %v233_v9 = vmax.f32 %v226_v8, -20.0 }
 0x3b5   :  { %v234_v10 = vmin.f32 %v233_v9, 2.0 }
 0x3b7   :  { %v235_v11 = vsel %vm232_vm11, %v234_v10, %v226_v8 }
 0x3b8   :  { %236 = vst [vmem:[%s436_s7] sm:$0xff] %v235_v11 }
 0x3b9   :  { %241 = vsyncpa [#allocation3], 1 }
 0x3ba   :  { %242 = vsyncpa [#allocation5], 1 }

</bundles_post_ra>
